<compile_context>
chip_gen: v6e
topology: v6e:2x2x1
jax: 0.10.0
libtpu: 0.0.40
codegen_flags: <defaults>
</compile_context>

<pallas_src>
import functools

import jax
import jax.numpy as jnp
from jax.experimental import pallas as pl
from jax.experimental.pallas import tpu as pltpu

_LANE = 128
_MAX_TILE_ROWS = 4096   # 4096*128*4B = 2 MiB per f32 input buffer (x2 inputs x2 bufs = 8 MiB)
_NUM_PARTIALS = 2       # >=2 lets v7x's two TensorCores split the reduction


def _dice_kernel(x_ref, t_ref, out_ref, *, use_sigmoid, n_valid, tile_rows,
                 blocks_per_partial):
    i = pl.program_id(0)   # parallel partial index
    j = pl.program_id(1)   # sequential reduction step within the partial

    @pl.when(j == 0)
    def _init():
        out_ref[...] = jnp.zeros_like(out_ref)

    block_elems = tile_rows * _LANE
    block_id = i * blocks_per_partial + j
    # Elements of the flat array still ahead of this block's start.
    remaining = n_valid - block_id * block_elems

    x = x_ref[...].astype(jnp.float32)
    if use_sigmoid:
        x = jax.nn.sigmoid(x)
    t = t_ref[...].astype(jnp.float32)

    # Fast path: the block is entirely inside the valid element range.  No
    # iota / compare / select work in the hot loop.
    @pl.when(remaining >= block_elems)
    def _full_block():
        # intersection partial: sum(x*t); union partial: sum(x)+sum(t)=sum(x+t)
        out_ref[0, 0] += jnp.sum(x * t, axis=0, keepdims=True)
        out_ref[0, 1] += jnp.sum(x + t, axis=0, keepdims=True)

    # Ragged path: only the boundary block (covers the wrapper's <128-element
    # lane padding and the undefined data past the array end in the clamped
    # boundary DMA).  Blocks fully past the end (clamped duplicates from an
    # uneven parallel split) have remaining <= 0 and are skipped entirely.
    @pl.when(jnp.logical_and(remaining > 0, remaining < block_elems))
    def _ragged_block():
        elem_in_block = (
            jax.lax.broadcasted_iota(jnp.int32, (tile_rows, _LANE), 0) * _LANE
            + jax.lax.broadcasted_iota(jnp.int32, (tile_rows, _LANE), 1))
        mask = elem_in_block < remaining
        xm = jnp.where(mask, x, 0.0)
        tm = jnp.where(mask, t, 0.0)
        out_ref[0, 0] += jnp.sum(xm * tm, axis=0, keepdims=True)
        out_ref[0, 1] += jnp.sum(xm + tm, axis=0, keepdims=True)


def dice_only(inputs, targets, smooth=1.0, use_sigmoid=True):
    """JAX/Pallas equivalent of DiceOnly.forward (smooth defaults to 1 as in
    the reference, which always uses DiceLoss's default smooth)."""
    x = jnp.reshape(inputs, (-1,))
    t = jnp.reshape(targets, (-1,))
    n = x.shape[0]

    # Only lane-pad (<128 elements) when needed so the flat view reshapes to
    # (rows, 128); padded elements are masked out inside the kernel.
    padded_n = pl.cdiv(n, _LANE) * _LANE
    if padded_n != n:
        x = jnp.pad(x, (0, padded_n - n))
        t = jnp.pad(t, (0, padded_n - n))
    rows = padded_n // _LANE
    x2 = x.reshape(rows, _LANE)
    t2 = t.reshape(rows, _LANE)

    # Row tile: as large as possible (HBM-streaming kernel) while staying well
    # inside the default scoped-VMEM budget on every TPU generation.  It is
    # either the full row extent or a multiple of 8, so the BlockSpec (8,128)
    # rule is always satisfied.
    tile_rows = min(_MAX_TILE_ROWS, rows)
    row_blocks = pl.cdiv(rows, tile_rows)
    num_partials = min(_NUM_PARTIALS, row_blocks)
    bpp = pl.cdiv(row_blocks, num_partials)   # blocks per partial

    def idx_map(i, j):
        # Clamp so no block index points fully outside the array.  Clamped
        # duplicate blocks repeat the previous step's index (DMA elided by the
        # pipeline) and are skipped by the in-kernel pl.when guard.
        return (jnp.minimum(i * bpp + j, row_blocks - 1), 0)

    kernel = functools.partial(
        _dice_kernel,
        use_sigmoid=bool(use_sigmoid),
        n_valid=int(n),
        tile_rows=int(tile_rows),
        blocks_per_partial=int(bpp),
    )

    partials = pl.pallas_call(
        kernel,
        out_shape=jax.ShapeDtypeStruct((num_partials, 2, 1, _LANE), jnp.float32),
        grid=(num_partials, bpp),
        in_specs=[
            pl.BlockSpec((tile_rows, _LANE), idx_map),
            pl.BlockSpec((tile_rows, _LANE), idx_map),
        ],
        out_specs=pl.BlockSpec((1, 2, 1, _LANE), lambda i, j: (i, 0, 0, 0)),
        compiler_params=pltpu.CompilerParams(
            dimension_semantics=("parallel", "arbitrary")
        ),
    )(x2, t2)

    sums = jnp.sum(partials, axis=(0, 2, 3))     # tiny (P,2,1,128) -> (2,)
    intersection = sums[0]
    union = sums[1]
    smooth = jnp.float32(smooth)
    dice = (2.0 * intersection + smooth) / (union + smooth)
    return 1.0 - dice


def _reference(inputs, targets, smooth=1.0, use_sigmoid=True):
    x = jnp.reshape(inputs, (-1,)).astype(jnp.float32)
    if use_sigmoid:
        x = jax.nn.sigmoid(x)
    t = jnp.reshape(targets, (-1,)).astype(jnp.float32)
    inter = jnp.sum(x * t)
    union = jnp.sum(x) + jnp.sum(t)
    dice = (2.0 * inter + smooth) / (union + smooth)
    return 1.0 - dice


if __name__ == "__main__":
    key = jax.random.PRNGKey(0)

    # Primary small test: NCHW-like batch=2, channels=4, spatial=16x16.
    kx, kt = jax.random.split(key)
    x = jax.random.normal(kx, (2, 4, 16, 16), dtype=jnp.float32)
    t = (jax.random.uniform(kt, (2, 4, 16, 16)) > 0.5).astype(jnp.float32)
    loss = jax.block_until_ready(dice_only(x, t, smooth=1.0, use_sigmoid=True))
    ref = _reference(x, t, smooth=1.0, use_sigmoid=True)
    assert jnp.allclose(loss, ref, rtol=1e-5, atol=1e-5), (loss, ref)

    # Ragged test: flat size not a multiple of 128, rows not a multiple of 8,
    # exercises the lane-pad + masked-branch path and use_sigmoid=False.
    kx2, kt2 = jax.random.split(kt)
    x2 = jax.nn.sigmoid(jax.random.normal(kx2, (3, 1, 300, 217), dtype=jnp.float32))
    t2 = (jax.random.uniform(kt2, (3, 1, 300, 217)) > 0.5).astype(jnp.float32)
    loss2 = jax.block_until_ready(dice_only(x2, t2, smooth=1.0, use_sigmoid=False))
    ref2 = _reference(x2, t2, smooth=1.0, use_sigmoid=False)
    assert jnp.allclose(loss2, ref2, rtol=1e-5, atol=1e-5), (loss2, ref2)

    # Multi-block test: >1M elements -> 3 row-blocks, 2 parallel partials,
    # exercises the fast full-block branch, the ragged boundary block and the
    # skipped clamped duplicate block.
    kx3, kt3 = jax.random.split(kt2)
    x3 = jax.random.normal(kx3, (2, 2, 512, 520), dtype=jnp.float32)
    t3 = (jax.random.uniform(kt3, (2, 2, 512, 520)) > 0.5).astype(jnp.float32)
    loss3 = jax.block_until_ready(dice_only(x3, t3, smooth=1.0, use_sigmoid=True))
    ref3 = _reference(x3, t3, smooth=1.0, use_sigmoid=True)
    assert jnp.allclose(loss3, ref3, rtol=1e-5, atol=1e-5), (loss3, ref3)

    print("KERNEL_OK")
</pallas_src>

<mosaic_0001>
module attributes {stable_mosaic.version = 11 : i64} {
  func.func @_dice_kernel(%arg0: i32, %arg1: i32, %arg2: memref<16x128xf32, #tpu.memory_space<vmem>>, %arg3: memref<16x128xf32, #tpu.memory_space<vmem>>, %arg4: memref<1x2x1x128xf32, #tpu.memory_space<vmem>>) attributes {dimension_semantics = [#tpu.dimension_semantics<parallel>, #tpu.dimension_semantics<arbitrary>], iteration_bounds = array<i64: 1, 1>, scalar_prefetch = 0 : i64, scratch_operands = 0 : i64, tpu.core_type = #tpu.core_type<tc>, window_params = [{transform_indices = @transform_0, window_bounds = array<i64: 16, 128>}, {transform_indices = @transform_1, window_bounds = array<i64: 16, 128>}, {transform_indices = @transform_2, window_bounds = array<i64: 1, 2, 1, 128>}]} {
    %c0_i32 = arith.constant 0 : i32
    %0 = arith.cmpi eq, %arg1, %c0_i32 : i32
    %1 = arith.extui %0 : i1 to i32
    %c0_i32_0 = arith.constant 0 : i32
    %2 = arith.cmpi ne, %1, %c0_i32_0 : i32
    scf.if %2 {
      %cst_10 = arith.constant 0.000000e+00 : f32
      %22 = vector.broadcast %cst_10 : f32 to vector<1x2x1x128xf32>
      %c0_11 = arith.constant 0 : index
      %c0_12 = arith.constant 0 : index
      %c0_13 = arith.constant 0 : index
      %c0_14 = arith.constant 0 : index
      %23 = vector.load %arg4[%c0_11, %c0_12, %c0_13, %c0_14] : memref<1x2x1x128xf32, #tpu.memory_space<vmem>>, vector<1x2x1x128xf32>
      tpu.vector_store %arg4[%c0_11, %c0_12, %c0_13, %c0_14], %22 {strides = array<i32>} : memref<1x2x1x128xf32, #tpu.memory_space<vmem>>, vector<1x2x1x128xf32>,
    } else {
    }
    %c1_i32 = arith.constant 1 : i32
    %3 = arith.muli %arg0, %c1_i32 : i32
    %4 = arith.addi %3, %arg1 : i32
    %c2048_i32 = arith.constant 2048 : i32
    %5 = arith.muli %4, %c2048_i32 : i32
    %c2048_i32_1 = arith.constant 2048 : i32
    %6 = arith.subi %c2048_i32_1, %5 : i32
    %c0 = arith.constant 0 : index
    %c0_2 = arith.constant 0 : index
    %7 = vector.load %arg2[%c0, %c0_2] : memref<16x128xf32, #tpu.memory_space<vmem>>, vector<16x128xf32>
    %8 = arith.negf %7 : vector<16x128xf32>
    %9 = math.exp %8 : vector<16x128xf32>
    %cst = arith.constant 1.000000e+00 : f32
    %10 = vector.broadcast %cst : f32 to vector<16x128xf32>
    %11 = arith.addf %10, %9 : vector<16x128xf32>
    %12 = arith.divf %10, %11 : vector<16x128xf32>
    %c0_3 = arith.constant 0 : index
    %c0_4 = arith.constant 0 : index
    %13 = vector.load %arg3[%c0_3, %c0_4] : memref<16x128xf32, #tpu.memory_space<vmem>>, vector<16x128xf32>
    %c2048_i32_5 = arith.constant 2048 : i32
    %14 = arith.cmpi sge, %6, %c2048_i32_5 : i32
    %15 = arith.extui %14 : i1 to i32
    %c0_i32_6 = arith.constant 0 : i32
    %16 = arith.cmpi ne, %15, %c0_i32_6 : i32
    scf.if %16 {
      %c0_10 = arith.constant 0 : index
      %c0_11 = arith.constant 0 : index
      %c0_12 = arith.constant 0 : index
      %c0_13 = arith.constant 0 : index
      %22 = vector.load %arg4[%c0_10, %c0_11, %c0_12, %c0_13] : memref<1x2x1x128xf32, #tpu.memory_space<vmem>>, vector<1x1x1x128xf32>
      %23 = vector.shape_cast %22 : vector<1x1x1x128xf32> to vector<1x128xf32>
      %24 = arith.mulf %12, %13 : vector<16x128xf32>
      %cst_14 = arith.constant dense<0.000000e+00> : vector<128xf32>
      %25 = vector.multi_reduction <add>, %24, %cst_14 [0] : vector<16x128xf32> to vector<128xf32>
      %26 = vector.shape_cast %25 : vector<128xf32> to vector<1x128xf32>
      %27 = arith.addf %23, %26 : vector<1x128xf32>
      %c0_15 = arith.constant 0 : index
      %c0_16 = arith.constant 0 : index
      %c0_17 = arith.constant 0 : index
      %c0_18 = arith.constant 0 : index
      %28 = vector.load %arg4[%c0_15, %c0_16, %c0_17, %c0_18] : memref<1x2x1x128xf32, #tpu.memory_space<vmem>>, vector<1x1x1x128xf32>
      %29 = vector.shape_cast %28 : vector<1x1x1x128xf32> to vector<1x128xf32>
      %30 = vector.shape_cast %27 : vector<1x128xf32> to vector<1x1x1x128xf32>
      tpu.vector_store %arg4[%c0_15, %c0_16, %c0_17, %c0_18], %30 {strides = array<i32>} : memref<1x2x1x128xf32, #tpu.memory_space<vmem>>, vector<1x1x1x128xf32>,
      %c0_19 = arith.constant 0 : index
      %c1 = arith.constant 1 : index
      %c0_20 = arith.constant 0 : index
      %c0_21 = arith.constant 0 : index
      %31 = vector.load %arg4[%c0_19, %c1, %c0_20, %c0_21] : memref<1x2x1x128xf32, #tpu.memory_space<vmem>>, vector<1x1x1x128xf32>
      %32 = vector.shape_cast %31 : vector<1x1x1x128xf32> to vector<1x128xf32>
      %33 = arith.addf %12, %13 : vector<16x128xf32>
      %cst_22 = arith.constant dense<0.000000e+00> : vector<128xf32>
      %34 = vector.multi_reduction <add>, %33, %cst_22 [0] : vector<16x128xf32> to vector<128xf32>
      %35 = vector.shape_cast %34 : vector<128xf32> to vector<1x128xf32>
      %36 = arith.addf %32, %35 : vector<1x128xf32>
      %c0_23 = arith.constant 0 : index
      %c1_24 = arith.constant 1 : index
      %c0_25 = arith.constant 0 : index
      %c0_26 = arith.constant 0 : index
      %37 = vector.load %arg4[%c0_23, %c1_24, %c0_25, %c0_26] : memref<1x2x1x128xf32, #tpu.memory_space<vmem>>, vector<1x1x1x128xf32>
      %38 = vector.shape_cast %37 : vector<1x1x1x128xf32> to vector<1x128xf32>
      %39 = vector.shape_cast %36 : vector<1x128xf32> to vector<1x1x1x128xf32>
      tpu.vector_store %arg4[%c0_23, %c1_24, %c0_25, %c0_26], %39 {strides = array<i32>} : memref<1x2x1x128xf32, #tpu.memory_space<vmem>>, vector<1x1x1x128xf32>,
    } else {
    }
    %c0_i32_7 = arith.constant 0 : i32
    %17 = arith.cmpi sgt, %6, %c0_i32_7 : i32
    %c2048_i32_8 = arith.constant 2048 : i32
    %18 = arith.cmpi slt, %6, %c2048_i32_8 : i32
    %19 = arith.andi %17, %18 : i1
    %20 = arith.extui %19 : i1 to i32
    %c0_i32_9 = arith.constant 0 : i32
    %21 = arith.cmpi ne, %20, %c0_i32_9 : i32
    scf.if %21 {
      %22 = tpu.iota {dimensions = array<i32: 0>} : vector<16x128xi32>
      %c128_i32 = arith.constant 128 : i32
      %23 = vector.broadcast %c128_i32 : i32 to vector<16x128xi32>
      %24 = arith.muli %22, %23 : vector<16x128xi32>
      %25 = tpu.iota {dimensions = array<i32: 1>} : vector<16x128xi32>
      %26 = arith.addi %24, %25 : vector<16x128xi32>
      %27 = vector.broadcast %6 : i32 to vector<16x128xi32>
      %28 = arith.cmpi slt, %26, %27 : vector<16x128xi32>
      %cst_10 = arith.constant 0.000000e+00 : f32
      %29 = vector.broadcast %cst_10 : f32 to vector<16x128xf32>
      %30 = arith.select %28, %12, %29 : vector<16x128xi1>, vector<16x128xf32>
      %cst_11 = arith.constant 0.000000e+00 : f32
      %31 = vector.broadcast %cst_11 : f32 to vector<16x128xf32>
      %32 = arith.select %28, %13, %31 : vector<16x128xi1>, vector<16x128xf32>
      %c0_12 = arith.constant 0 : index
      %c0_13 = arith.constant 0 : index
      %c0_14 = arith.constant 0 : index
      %c0_15 = arith.constant 0 : index
      %33 = vector.load %arg4[%c0_12, %c0_13, %c0_14, %c0_15] : memref<1x2x1x128xf32, #tpu.memory_space<vmem>>, vector<1x1x1x128xf32>
      %34 = vector.shape_cast %33 : vector<1x1x1x128xf32> to vector<1x128xf32>
      %35 = arith.mulf %30, %32 : vector<16x128xf32>
      %cst_16 = arith.constant dense<0.000000e+00> : vector<128xf32>
      %36 = vector.multi_reduction <add>, %35, %cst_16 [0] : vector<16x128xf32> to vector<128xf32>
      %37 = vector.shape_cast %36 : vector<128xf32> to vector<1x128xf32>
      %38 = arith.addf %34, %37 : vector<1x128xf32>
      %c0_17 = arith.constant 0 : index
      %c0_18 = arith.constant 0 : index
      %c0_19 = arith.constant 0 : index
      %c0_20 = arith.constant 0 : index
      %39 = vector.load %arg4[%c0_17, %c0_18, %c0_19, %c0_20] : memref<1x2x1x128xf32, #tpu.memory_space<vmem>>, vector<1x1x1x128xf32>
      %40 = vector.shape_cast %39 : vector<1x1x1x128xf32> to vector<1x128xf32>
      %41 = vector.shape_cast %38 : vector<1x128xf32> to vector<1x1x1x128xf32>
      tpu.vector_store %arg4[%c0_17, %c0_18, %c0_19, %c0_20], %41 {strides = array<i32>} : memref<1x2x1x128xf32, #tpu.memory_space<vmem>>, vector<1x1x1x128xf32>,
      %c0_21 = arith.constant 0 : index
      %c1 = arith.constant 1 : index
      %c0_22 = arith.constant 0 : index
      %c0_23 = arith.constant 0 : index
      %42 = vector.load %arg4[%c0_21, %c1, %c0_22, %c0_23] : memref<1x2x1x128xf32, #tpu.memory_space<vmem>>, vector<1x1x1x128xf32>
      %43 = vector.shape_cast %42 : vector<1x1x1x128xf32> to vector<1x128xf32>
      %44 = arith.addf %30, %32 : vector<16x128xf32>
      %cst_24 = arith.constant dense<0.000000e+00> : vector<128xf32>
      %45 = vector.multi_reduction <add>, %44, %cst_24 [0] : vector<16x128xf32> to vector<128xf32>
      %46 = vector.shape_cast %45 : vector<128xf32> to vector<1x128xf32>
      %47 = arith.addf %43, %46 : vector<1x128xf32>
      %c0_25 = arith.constant 0 : index
      %c1_26 = arith.constant 1 : index
      %c0_27 = arith.constant 0 : index
      %c0_28 = arith.constant 0 : index
      %48 = vector.load %arg4[%c0_25, %c1_26, %c0_27, %c0_28] : memref<1x2x1x128xf32, #tpu.memory_space<vmem>>, vector<1x1x1x128xf32>
      %49 = vector.shape_cast %48 : vector<1x1x1x128xf32> to vector<1x128xf32>
      %50 = vector.shape_cast %47 : vector<1x128xf32> to vector<1x1x1x128xf32>
      tpu.vector_store %arg4[%c0_25, %c1_26, %c0_27, %c0_28], %50 {strides = array<i32>} : memref<1x2x1x128xf32, #tpu.memory_space<vmem>>, vector<1x1x1x128xf32>,
    } else {
    }
    return
  }
  func.func @transform_0(%arg0: i32, %arg1: i32) -> (i32, i32) {
    %c1_i32 = arith.constant 1 : i32
    %0 = arith.muli %arg0, %c1_i32 : i32
    %1 = arith.addi %0, %arg1 : i32
    %c0_i32 = arith.constant 0 : i32
    %2 = arith.minsi %1, %c0_i32 : i32
    %c0_i32_0 = arith.constant 0 : i32
    %c0_i32_1 = arith.constant 0 : i32
    return %2, %c0_i32_0 : i32, i32
  }
  func.func @transform_1(%arg0: i32, %arg1: i32) -> (i32, i32) {
    %c1_i32 = arith.constant 1 : i32
    %0 = arith.muli %arg0, %c1_i32 : i32
    %1 = arith.addi %0, %arg1 : i32
    %c0_i32 = arith.constant 0 : i32
    %2 = arith.minsi %1, %c0_i32 : i32
    %c0_i32_0 = arith.constant 0 : i32
    %c0_i32_1 = arith.constant 0 : i32
    return %2, %c0_i32_0 : i32, i32
  }
  func.func @transform_2(%arg0: i32, %arg1: i32) -> (i32, i32, i32, i32) {
    %c0_i32 = arith.constant 0 : i32
    %c0_i32_0 = arith.constant 0 : i32
    %c0_i32_1 = arith.constant 0 : i32
    %c0_i32_2 = arith.constant 0 : i32
    return %arg0, %c0_i32, %c0_i32_0, %c0_i32_1 : i32, i32, i32, i32
  }
}

</mosaic_0001>

<bundles_post_ra>
// kernel: tpu_custom_call.1
= control target key start
LH: loop header
LB: loop body
LE: loop exit
PB: predicated region body
PF: predicated region fallthrough
CT: control target
= control target key end

     0   :  { %7 = vsyncpa [#allocation3], 0  ;;  %s299_s0 = inlined_call_operand.hbm [shape: f32[16,128], index: 0, kind: input, shape index: {}]   ;;  %s300_s1 = inlined_call_operand.hbm [shape: f32[16,128], index: 1, kind: input, shape index: {}]   ;;  %s301_s2 = inlined_call_operand.hbm [shape: f32[1,2,1,128], index: 2, kind: output, shape index: {}]  }
   0x1   :  { %8 = vsyncpa [#allocation6], 0 }
   0x2   :  { %9 = vsyncpa [#allocation4], 0  ;;  %s267_s9 = smov [#allocation2]  }
   0x3   :  { %s21_s10 = sshll.u32 %s267_s9, 4  ;;  %s22_s10 = int_to_ptr.vmem [resolvable:$true] %s21_s10 }
   0x4   :  { %s209_s11 = scalar_lea.vmem %s22_s10, 256  ;;  %p214_p1 = scmp.lt.s32.totalorder %s22_s10, %s22_s10 }
   0x5   :  { %p210_p0 = scmp.ne.s32.totalorder %s22_s10, %s209_s11  ;;  %p215_p2 = scmp.lt.s32.totalorder %s209_s11, %s209_s11 }
   0x7   :  { %p216_p3 = por %p215_p2, %p214_p1 }
   0x9   :  { %p217_p4 = pnand %p216_p3, %p210_p0 }
   0xb   :  { %220 = shalt.err (!%p217_p4)
}
   0xc   :  { %s268_s12 = smov 128   ;;  %s269_s13 = smov 8  }
   0xd   :  { %27 = dma.hbm_to_vmem [thread:$0]  %s299_s0, 256, %s22_s10, [#allocation3], %s268_s12, %s268_s12, %s269_s13  }
   0xe   :  { %s270_s16 = smov [#allocation5]  }
   0xf   :  { %s39_s17 = sshll.u32 %s270_s16, 4  ;;  %s40_s17 = int_to_ptr.vmem [resolvable:$true] %s39_s17 }
  0x10   :  { %s229_s18 = scalar_lea.vmem %s40_s17, 256  ;;  %p234_p6 = scmp.lt.s32.totalorder %s40_s17, %s40_s17 }
  0x11   :  { %p230_p5 = scmp.ne.s32.totalorder %s40_s17, %s229_s18  ;;  %p235_p7 = scmp.lt.s32.totalorder %s229_s18, %s229_s18 }
  0x13   :  { %p236_p8 = por %p235_p7, %p234_p6 }
  0x15   :  { %p237_p9 = pnand %p236_p8, %p230_p5 }
  0x17   :  { %240 = shalt.err (!%p237_p9)
}
  0x18   :  { %45 = dma.hbm_to_vmem [thread:$0]  %s300_s1, 256, %s40_s17, [#allocation6], %s268_s12, %s268_s12, %s269_s13  }
  0x19   :  { %261 = dma.done.wait [#allocation3], 256  }
  0x1a   :  { %262 = vsyncadd [#allocation3], 4294967040 }
  0x1b   :  { %263 = dma.done.wait [#allocation6], 256  }
  0x1c   :  { %264 = vsyncadd [#allocation6], 4294967040  ;;  %v271_v0 = vmov 0.0   ;;  %v69_v1 = vld [vmem:[#allocation2] sm:$0xff]  ;;  %v70_v2 = vld [vmem:[#allocation2 + $0x8] sm:$0xff]  ;;  %s272_s0 = smov [#allocation7]  }
  0x1d   :  { %64 = vst [vmem:[#allocation7] sm:$0x1] %v271_v0  ;;  %65 = vst [vmem:[#allocation7 + $0x1] sm:$0x1] %v271_v0  ;;  %v183_v3 = vmul.f32 -1.442695, %v69_v1 }
  0x1e   :  { %v184_v4 = vmul.f32 -1.442695, %v70_v2  ;;  %v83_v9 = vld [vmem:[#allocation5] sm:$0xff]  ;;  %v84_v10 = vld [vmem:[#allocation5 + $0x8] sm:$0xff]  ;;  %s166_s1 = sshll.u32 %s272_s0, 4  ;;  %s167_s1 = int_to_ptr.vmem [resolvable:$true] %s166_s1 }
  0x1f   :  { %193 = vpow2.f32 %v183_v3  ;;  %s241_s21 = scalar_lea.vmem %s167_s1, 32  ;;  %p246_p11 = scmp.lt.s32.totalorder %s167_s1, %s167_s1 }
  0x20   :  { %195 = vpow2.f32 %v184_v4  ;;  %p242_p10 = scmp.ne.s32.totalorder %s167_s1, %s241_s21  ;;  %p247_p12 = scmp.lt.s32.totalorder %s241_s21, %s241_s21 }
  0x22   :  { %p248_p13 = por %p247_p12, %p246_p11 }
  0x24   :  { %v89_v29 = vld [vmem:[#allocation7] sm:$0x1]  ;;  %v102_v30 = vld [vmem:[#allocation7 + $0x1] sm:$0x1]  ;;  %p249_p0 = pnand %p248_p13, %p242_p10 }
  0x2c   :  { %v194_v5 = vpop.eup %193 }
  0x2d   :  { %v196_v6 = vpop.eup %195  ;;  %v77_v7 = vadd.f32 1.0, %v194_v5 }
  0x2e   :  { %v78_v8 = vadd.f32 1.0, %v196_v6 }
  0x2f   :  { %197 = vrcp.f32 %v77_v7 }
  0x30   :  { %199 = vrcp.f32 %v78_v8 }
  0x3c   :  { %v198_v11 = vpop.eup %197 }
  0x3d   :  { %v200_v12 = vpop.eup %199  ;;  %v90_v13 = vmul.f32 %v198_v11, %v83_v9  ;;  %v103_v14 = vadd.f32 %v198_v11, %v83_v9 }
  0x3e   :  { %v91_v15 = vmul.f32 %v200_v12, %v84_v10  ;;  %v104_v16 = vadd.f32 %v200_v12, %v84_v10 }
  0x40   :  { %v92_v17 = vadd.f32 %v91_v15, %v90_v13  ;;  %v105_v18 = vadd.f32 %v104_v16, %v103_v14 }
  0x42   :  { %v93_v19 = vrot.slane %v92_v17, 4  ;;  %v106_v20 = vrot.slane %v105_v18, 4 }
  0x44   :  { %v94_v21 = vadd.f32 %v93_v19, %v92_v17  ;;  %v107_v22 = vadd.f32 %v106_v20, %v105_v18 }
  0x46   :  { %v95_v23 = vrot.slane %v94_v21, 2  ;;  %v108_v24 = vrot.slane %v107_v22, 2 }
  0x48   :  { %v96_v25 = vadd.f32 %v95_v23, %v94_v21  ;;  %v109_v26 = vadd.f32 %v108_v24, %v107_v22 }
  0x4a   :  { %v97_v27 = vrot.slane %v96_v25, 1  ;;  %v110_v28 = vrot.slane %v109_v26, 1 }
  0x4c   :  { %v98_v31 = vadd.f32 %v97_v27, %v96_v25  ;;  %v111_v32 = vadd.f32 %v110_v28, %v109_v26 }
  0x4e   :  { %v99_v33 = vadd.f32 %v98_v31, %v89_v29  ;;  %v112_v34 = vadd.f32 %v111_v32, %v102_v30 }
  0x50   :  { %100 = vst [vmem:[#allocation7] sm:$0x1] %v99_v33  ;;  %113 = vst [vmem:[#allocation7 + $0x1] sm:$0x1] %v112_v34 }
  0x51   :  { %252 = shalt.err (!%p249_p0)
}
  0x52   :  { %s273_s22 = smov 16   ;;  %s274_s23 = smov 1  }
  0x53   :  { %172 = dma.vmem_to_hbm [thread:$0]  %s167_s1, 32, %s301_s2, [#allocation4], %s273_s22, %s273_s22, %s274_s23  }
  0x54   :  { %265 = dma.done.wait [#allocation4], 32  }
  0x55   :  { %266 = vsyncadd [#allocation4], 4294967264 }
  0x56   :  { %176 = vsyncpa [#allocation3], 1 }
  0x57   :  { %177 = vsyncpa [#allocation6], 1 }
  0x58   :  { %178 = vsyncpa [#allocation4], 1 }

</bundles_post_ra>
